<compile_context>
chip_gen: v5e
topology: v5e:2x2
jax: 0.10.0
libtpu: 0.0.40
codegen_flags: <defaults>
</compile_context>

<pallas_src>
import functools

import jax
import jax.numpy as jnp
from jax.experimental import pallas as pl
from jax.experimental.pallas import tpu as pltpu


def _round_up(n, m):
    return ((n + m - 1) // m) * m


def _pick_ti(inter, target):
    """Largest multiple of 128 that divides `inter` and is <= target."""
    assert inter % 128 == 0, "intermediate_size must be a multiple of 128"
    units = inter // 128
    best = 128
    for k in range(1, units + 1):
        if units % k == 0 and k * 128 <= target:
            best = k * 128
    return best


def _vmem_capacity_bytes():
    try:
        return pltpu.get_tpu_info().vmem_capacity_bytes
    except Exception:
        return 128 * 1024 * 1024  # v5e/v6e default


def _llama_mlp_kernel(x_ref, wg_ref, wu_ref, wd_ref, o_ref, acc_ref):
    # x_ref:   (tm, H)
    # wg_ref:  (H, ti)   gate_proj weight tile j
    # wu_ref:  (H, ti)   up_proj weight tile j
    # wd_ref:  (ti, H)   down_proj weight tile j
    # o_ref:   (tm, H)
    # acc_ref: (tm, H) f32 scratch, accumulates the down projection across j
    j = pl.program_id(1)

    @pl.when(j == 0)
    def _():
        acc_ref[...] = jnp.zeros_like(acc_ref)

    x = x_ref[...]
    gate = jnp.dot(x, wg_ref[...], preferred_element_type=jnp.float32)
    up = jnp.dot(x, wu_ref[...], preferred_element_type=jnp.float32)
    # SiLU in f32 (EUP sigmoid), then gating.
    h = (gate * jax.nn.sigmoid(gate)) * up
    # Down projection of this I-tile, accumulated in f32.
    acc_ref[...] += jnp.dot(
        h.astype(wd_ref.dtype), wd_ref[...], preferred_element_type=jnp.float32
    )

    @pl.when(j == pl.num_programs(1) - 1)
    def _():
        o_ref[...] = acc_ref[...].astype(o_ref.dtype)


def llama_mlp(x, wg, wu, wd, *, tm=None, ti=None, vmem_limit_bytes=None):
    """x: [batch, seq, hidden]; wg/wu: [hidden, inter]; wd: [inter, hidden].

    For production use, pass bf16 x/weights (the VMEM-based tm/ti defaults
    assume <= 2-byte operands); f32 inputs work but halve the effective tiles.
    """
    batch, seq, hidden = x.shape
    inter = wg.shape[1]
    dtype = x.dtype
    M = batch * seq

    # ---- generation-aware defaults -------------------------------------
    vmem_cap = _vmem_capacity_bytes()
    big_vmem = vmem_cap >= 100 * 1024 * 1024  # v5e/v6e (128 MiB) vs v7x (64 MiB)
    itemsize = jnp.dtype(dtype).itemsize
    shrink = 2 if itemsize >= 4 else 1  # f32 operands -> halve tiles

    if ti is None:
        ti_target = (512 if big_vmem else 256) // shrink
        ti = _pick_ti(inter, max(128, ti_target))
    else:
        assert inter % ti == 0 and ti % 128 == 0, "ti must divide inter, mult of 128"
    nj = inter // ti

    if tm is None:
        tm = (768 if big_vmem else 512) // shrink
    if vmem_limit_bytes is None:
        vmem_limit_bytes = (96 if big_vmem else 56) * 1024 * 1024
    vmem_limit_bytes = min(vmem_limit_bytes, vmem_cap - 8 * 1024 * 1024)

    # ---- row tiling (sublane-aligned; >= 2 tiles for megacore sharding) --
    tm = max(8, min(tm, _round_up(M, 8)))
    tm = _round_up(tm, 8)
    if M > 8 and _round_up(M, tm) // tm < 2:
        tm = _round_up((M + 1) // 2, 8)  # split small M across both TCs
    M_pad = _round_up(M, tm)
    ni = M_pad // tm

    x2d = x.reshape(M, hidden)
    if M_pad != M:
        # Zero padding is numerically safe: silu(0) * up = 0.
        x2d = jnp.pad(x2d, ((0, M_pad - M), (0, 0)))

    w_item = jnp.dtype(wg.dtype).itemsize
    cost = pl.CostEstimate(
        flops=6 * M_pad * hidden * inter,  # gate + up + down matmuls
        transcendentals=M_pad * inter,     # sigmoid in SiLU
        bytes_accessed=(
            M_pad * hidden * itemsize                              # x
            + ni * 2 * hidden * inter * w_item                     # wg + wu, re-streamed
            + ni * inter * hidden * jnp.dtype(wd.dtype).itemsize   # wd, re-streamed
            + M_pad * hidden * itemsize                            # output
        ),
    )

    out2d = pl.pallas_call(
        _llama_mlp_kernel,
        out_shape=jax.ShapeDtypeStruct((M_pad, hidden), dtype),
        grid_spec=pltpu.PrefetchScalarGridSpec(
            num_scalar_prefetch=0,
            grid=(ni, nj),
            in_specs=[
                pl.BlockSpec((tm, hidden), lambda i, j: (i, 0)),    # x rows
                pl.BlockSpec((hidden, ti), lambda i, j: (0, j)),    # Wg_j
                pl.BlockSpec((hidden, ti), lambda i, j: (0, j)),    # Wu_j
                pl.BlockSpec((ti, hidden), lambda i, j: (j, 0)),    # Wd_j
            ],
            out_specs=pl.BlockSpec((tm, hidden), lambda i, j: (i, 0)),
            scratch_shapes=[pltpu.VMEM((tm, hidden), jnp.float32)],
        ),
        compiler_params=pltpu.CompilerParams(
            dimension_semantics=("parallel", "arbitrary"),
            vmem_limit_bytes=vmem_limit_bytes,
        ),
        cost_estimate=cost,
    )(x2d, wg, wu, wd)

    return out2d[:M].reshape(batch, seq, hidden)


def _reference(x, wg, wu, wd):
    gate = jnp.einsum("bsh,hi->bsi", x, wg)
    up = jnp.einsum("bsh,hi->bsi", x, wu)
    h = jax.nn.silu(gate) * up
    return jnp.einsum("bsi,ih->bsh", h, wd)


if __name__ == "__main__":
    batch, seq = 2, 8
    hidden, inter = 128, 512   # small but TPU-tile-friendly (multiples of 128)

    key = jax.random.PRNGKey(0)
    kx, kg, ku, kd = jax.random.split(key, 4)

    x = jax.random.normal(kx, (batch, seq, hidden), dtype=jnp.float32)
    # Deterministic synthetic weights (stored transposed: (in, out)).
    wg = jax.random.normal(kg, (hidden, inter), dtype=jnp.float32) * 0.02
    wu = jax.random.normal(ku, (hidden, inter), dtype=jnp.float32) * 0.02
    wd = jax.random.normal(kd, (inter, hidden), dtype=jnp.float32) * 0.02

    # ti=256 so the test exercises the I-axis accumulation (nj=2); tm is
    # auto-shrunk to 8 so the row (parallel) axis also has 2 tiles.
    out = jax.block_until_ready(llama_mlp(x, wg, wu, wd, ti=256))

    ref = _reference(x, wg, wu, wd)
    assert out.shape == (batch, seq, hidden)
    assert jnp.allclose(out, ref, atol=2e-4, rtol=2e-4), "mismatch vs reference"

    print("KERNEL_OK")
</pallas_src>

<mosaic_0001>
module attributes {stable_mosaic.version = 11 : i64} {
  func.func @_llama_mlp_kernel(%arg0: i32, %arg1: i32, %arg2: memref<8x128xf32, #tpu.memory_space<vmem>>, %arg3: memref<128x256xf32, #tpu.memory_space<vmem>>, %arg4: memref<128x256xf32, #tpu.memory_space<vmem>>, %arg5: memref<256x128xf32, #tpu.memory_space<vmem>>, %arg6: memref<8x128xf32, #tpu.memory_space<vmem>>, %arg7: memref<8x128xf32, #tpu.memory_space<vmem>>) attributes {dimension_semantics = [#tpu.dimension_semantics<parallel>, #tpu.dimension_semantics<arbitrary>], iteration_bounds = array<i64: 2, 2>, scalar_prefetch = 0 : i64, scratch_operands = 1 : i64, tpu.core_type = #tpu.core_type<tc>, window_params = [{transform_indices = @transform_0, window_bounds = array<i64: 8, 128>}, {transform_indices = @transform_1, window_bounds = array<i64: 128, 256>}, {transform_indices = @transform_2, window_bounds = array<i64: 128, 256>}, {transform_indices = @transform_3, window_bounds = array<i64: 256, 128>}, {transform_indices = @transform_4, window_bounds = array<i64: 8, 128>}]} {
    %c0_i32 = arith.constant 0 : i32
    %0 = arith.cmpi eq, %arg1, %c0_i32 : i32
    %1 = arith.extui %0 : i1 to i32
    %c0_i32_0 = arith.constant 0 : i32
    %2 = arith.cmpi ne, %1, %c0_i32_0 : i32
    scf.if %2 {
      %cst_16 = arith.constant 0.000000e+00 : f32
      %23 = vector.broadcast %cst_16 : f32 to vector<8x128xf32>
      %c0_17 = arith.constant 0 : index
      %c0_18 = arith.constant 0 : index
      %24 = vector.load %arg7[%c0_17, %c0_18] : memref<8x128xf32, #tpu.memory_space<vmem>>, vector<8x128xf32>
      tpu.vector_store %arg7[%c0_17, %c0_18], %23 {strides = array<i32>} : memref<8x128xf32, #tpu.memory_space<vmem>>, vector<8x128xf32>,
    } else {
    }
    %c0 = arith.constant 0 : index
    %c0_1 = arith.constant 0 : index
    %3 = vector.load %arg2[%c0, %c0_1] : memref<8x128xf32, #tpu.memory_space<vmem>>, vector<8x128xf32>
    %c0_2 = arith.constant 0 : index
    %c0_3 = arith.constant 0 : index
    %4 = vector.load %arg3[%c0_2, %c0_3] : memref<128x256xf32, #tpu.memory_space<vmem>>, vector<128x256xf32>
    %cst = arith.constant dense<0.000000e+00> : vector<8x256xf32>
    %5 = tpu.matmul %3, %4, %cst {dimension_numbers = #tpu.dot_dimension_numbers<[1], [0], [0], [1], [0, 0, 1, 1], [], []>} : vector<8x128xf32>, vector<128x256xf32>, vector<8x256xf32> -> vector<8x256xf32>
    %c0_4 = arith.constant 0 : index
    %c0_5 = arith.constant 0 : index
    %6 = vector.load %arg4[%c0_4, %c0_5] : memref<128x256xf32, #tpu.memory_space<vmem>>, vector<128x256xf32>
    %cst_6 = arith.constant dense<0.000000e+00> : vector<8x256xf32>
    %7 = tpu.matmul %3, %6, %cst_6 {dimension_numbers = #tpu.dot_dimension_numbers<[1], [0], [0], [1], [0, 0, 1, 1], [], []>} : vector<8x128xf32>, vector<128x256xf32>, vector<8x256xf32> -> vector<8x256xf32>
    %8 = arith.negf %5 : vector<8x256xf32>
    %9 = math.exp %8 : vector<8x256xf32>
    %cst_7 = arith.constant 1.000000e+00 : f32
    %10 = vector.broadcast %cst_7 : f32 to vector<8x256xf32>
    %11 = arith.addf %10, %9 : vector<8x256xf32>
    %12 = arith.divf %10, %11 : vector<8x256xf32>
    %13 = arith.mulf %5, %12 : vector<8x256xf32>
    %14 = arith.mulf %13, %7 : vector<8x256xf32>
    %c0_8 = arith.constant 0 : index
    %c0_9 = arith.constant 0 : index
    %15 = vector.load %arg7[%c0_8, %c0_9] : memref<8x128xf32, #tpu.memory_space<vmem>>, vector<8x128xf32>
    %c0_10 = arith.constant 0 : index
    %c0_11 = arith.constant 0 : index
    %16 = vector.load %arg5[%c0_10, %c0_11] : memref<256x128xf32, #tpu.memory_space<vmem>>, vector<256x128xf32>
    %cst_12 = arith.constant dense<0.000000e+00> : vector<8x128xf32>
    %17 = tpu.matmul %14, %16, %cst_12 {dimension_numbers = #tpu.dot_dimension_numbers<[1], [0], [0], [1], [0, 0, 1, 1], [], []>} : vector<8x256xf32>, vector<256x128xf32>, vector<8x128xf32> -> vector<8x128xf32>
    %18 = arith.addf %15, %17 : vector<8x128xf32>
    %c0_13 = arith.constant 0 : index
    %c0_14 = arith.constant 0 : index
    %19 = vector.load %arg7[%c0_13, %c0_14] : memref<8x128xf32, #tpu.memory_space<vmem>>, vector<8x128xf32>
    tpu.vector_store %arg7[%c0_13, %c0_14], %18 {strides = array<i32>} : memref<8x128xf32, #tpu.memory_space<vmem>>, vector<8x128xf32>,
    %c1_i32 = arith.constant 1 : i32
    %20 = arith.cmpi eq, %arg1, %c1_i32 : i32
    %21 = arith.extui %20 : i1 to i32
    %c0_i32_15 = arith.constant 0 : i32
    %22 = arith.cmpi ne, %21, %c0_i32_15 : i32
    scf.if %22 {
      %c0_16 = arith.constant 0 : index
      %c0_17 = arith.constant 0 : index
      %23 = vector.load %arg7[%c0_16, %c0_17] : memref<8x128xf32, #tpu.memory_space<vmem>>, vector<8x128xf32>
      %c0_18 = arith.constant 0 : index
      %c0_19 = arith.constant 0 : index
      %24 = vector.load %arg6[%c0_18, %c0_19] : memref<8x128xf32, #tpu.memory_space<vmem>>, vector<8x128xf32>
      tpu.vector_store %arg6[%c0_18, %c0_19], %23 {strides = array<i32>} : memref<8x128xf32, #tpu.memory_space<vmem>>, vector<8x128xf32>,
    } else {
    }
    return
  }
  func.func @transform_0(%arg0: i32, %arg1: i32) -> (i32, i32) {
    %c0_i32 = arith.constant 0 : i32
    %c0_i32_0 = arith.constant 0 : i32
    return %arg0, %c0_i32 : i32, i32
  }
  func.func @transform_1(%arg0: i32, %arg1: i32) -> (i32, i32) {
    %c0_i32 = arith.constant 0 : i32
    %c0_i32_0 = arith.constant 0 : i32
    return %c0_i32, %arg1 : i32, i32
  }
  func.func @transform_2(%arg0: i32, %arg1: i32) -> (i32, i32) {
    %c0_i32 = arith.constant 0 : i32
    %c0_i32_0 = arith.constant 0 : i32
    return %c0_i32, %arg1 : i32, i32
  }
  func.func @transform_3(%arg0: i32, %arg1: i32) -> (i32, i32) {
    %c0_i32 = arith.constant 0 : i32
    %c0_i32_0 = arith.constant 0 : i32
    return %arg1, %c0_i32 : i32, i32
  }
  func.func @transform_4(%arg0: i32, %arg1: i32) -> (i32, i32) {
    %c0_i32 = arith.constant 0 : i32
    %c0_i32_0 = arith.constant 0 : i32
    return %arg0, %c0_i32 : i32, i32
  }
}

</mosaic_0001>

<bundles_post_ra>
// kernel: tpu_custom_call.1
= control target key start
LH: loop header
LB: loop body
LE: loop exit
PB: predicated region body
PF: predicated region fallthrough
CT: control target
= control target key end

     0   :  { %s1609_s0 = inlined_call_operand.hbm [shape: f32[16,128], index: 0, kind: input, shape index: {}]   ;;  %s1610_s1 = inlined_call_operand.hbm [shape: f32[128,512], index: 1, kind: input, shape index: {}]   ;;  %s1611_s2 = inlined_call_operand.hbm [shape: f32[128,512], index: 2, kind: input, shape index: {}]   ;;  %s1612_s3 = inlined_call_operand.hbm [shape: f32[512,128], index: 3, kind: input, shape index: {}]   ;;  %s1613_s4 = inlined_call_operand.hbm [shape: f32[16,128], index: 4, kind: output, shape index: {}]  }
   0x1   :  { %1630 = sst [smem:[#allocation28_spill]] %s1609_s0 }
   0x2   :  { %1631 = sst [smem:[#allocation29_spill]] %s1610_s1 }
   0x3   :  { %1632 = sst [smem:[#allocation30_spill]] %s1611_s2 }
   0x4   :  { %1633 = sst [smem:[#allocation31_spill]] %s1613_s4 }
   0x5   :  { %9 = vsyncpa [#allocation4], 0 }
   0x6   :  { %11 = vsyncpa [#allocation4 + $0x1], 0 }
   0x7   :  { %12 = vsyncpa [#allocation7], 0 }
   0x8   :  { %14 = vsyncpa [#allocation7 + $0x1], 0 }
   0x9   :  { %15 = vsyncpa [#allocation10], 0 }
   0xa   :  { %17 = vsyncpa [#allocation10 + $0x1], 0 }
   0xb   :  { %18 = vsyncpa [#allocation5], 0 }
   0xc   :  { %20 = vsyncpa [#allocation5 + $0x1], 0  ;;  %s1235_s15 = smov 0   ;;  %s1237_s16 = smov 0  }
   0xd   :  { %s1239_s17 = smov 0   ;;  %s1241_s18 = smov 0  }
   0xe   :  { %s1243_s19 = smov 0   ;;  %s1245_s20 = smov 0  }
   0xf   :  { %s1247_s21 = smov 0   ;;  %s1249_s22 = smov 0  }
  0x10   :  { %s1251_s23 = smov 0   ;;  %s1253_s24 = smov 0  }
  0x11   :  { %s1255_s25 = smov 0  }
  0x12 LB: > { %1634 = sst [smem:[#allocation16_spill]] %s1174_s18  ;;  %p53_p0 = scmp.eq.s32.totalorder %s1202_s25, 0  ;;  %s1202_s25 = sphi %s1255_s25, %s26_s25   ;;  %s1198_s24 = sphi %s1253_s24, %s1674_s24   ;;  %s1194_s23 = sphi %s1251_s23, %s1681_s23   ;;  %s1190_s22 = sphi %s1249_s22, %s1672_s22   ;;  %s1186_s21 = sphi %s1247_s21, %s1680_s21   ;;  %s1182_s20 = sphi %s1245_s20, %s1671_s20   ;;  %s1178_s19 = sphi %s1243_s19, %s1679_s19   ;;  %s1174_s18 = sphi %s1241_s18, %s1678_s18   ;;  %s1170_s17 = sphi %s1239_s17, %s1677_s17   ;;  %s1166_s16 = sphi %s1237_s16, %s1676_s16   ;;  %s1162_s15 = sphi %s1235_s15, %s1675_s15  }
  0x13   : > { %1635 = sst [smem:[#allocation17_spill]] %s1182_s20  ;;  %s71_s26 = sadd.s32 1, %s1170_s17 }
  0x14   : > { %1636 = sst [smem:[#allocation18_spill]] %s1186_s21  ;;  %p78_p1 = scmp.ne.s32.totalorder %s1170_s17, %s1166_s16 }
  0x15   : > { %1637 = sst [smem:[#allocation19_spill]] %s1190_s22  ;;  %p1618_p2 = scmp.lt.s32.totalorder %s1202_s25, 4 }
  0x16   : > { %1638 = sst [smem:[#allocation20_spill]] %s1198_s24  ;;  %s205_s27 = sand.u32 1, %s1202_s25  }
  0x17   : > { %1639 = sst [smem:[#allocation21_spill]] %s1202_s25  ;;  %p80_p3 = por %p78_p1, %p53_p0 }
  0x18   : > { %s1614_s28 = sand.u32 1, %s1170_s17   ;;  %s818_s29 = sshll.u32 %s1194_s23, 4 }
  0x19   : > { %s1302_s30 = sshll.u32 %s1614_s28, 8  ;;  %s1640_s1 = sld [smem:[#allocation29_spill]] }
  0x1a   : > { %s209_s9 = scalar_lea.vmem [#allocation6], %s1302_s30  ;;  %p1310_p4 = pnand %p1618_p2, %p80_p3 }
  0x1b   : > { %s217_s10 = sshll.u32 %s209_s9, 4  ;;  %s1314_s12 = scalar_lea.sflag [#allocation7], %s205_s27  ;;  %s218_s10 = int_to_ptr.vmem [resolvable:$true] %s217_s10 }
  0x1c   : > { %s1615_s13 = smov 512   ;;  %s1616_s14 = smov 256  }
  0x1d   : > { %s1617_s5 = smov 16   ;;  %s1642_s2 = sld [smem:[#allocation30_spill]] }
  0x1e   : > { %p804_p5 = scmp.ge.s32.totalorder %s1202_s25, 1  ;;  %p269_p6 = scmp.lt.s32.totalorder %s1202_s25, 5 }
  0x1f   : > { %s214_s7 = scalar_lea.hbm %s1640_s1, %s818_s29  ;;  %s38_s6 = sadd.s32 1, %s1198_s24 }
  0x20   : > { %s215_s8 = sshll.u32 %s214_s7, 4  ;;  %p1329_p7 = pnand %p804_p5, %p269_p6  ;;  %s216_s8 = int_to_ptr.hbm [resolvable:$true] %s215_s8 }
  0x21   : > { %837 = dma.hbm_to_vmem [thread:$0]  (!%p1310_p4), %s216_s8, 4096, %s218_s10, %s1314_s12, %s1615_s13, %s1616_s14, %s1617_s5  }
  0x22   : > { %s1334_s8 = sadd.s32 4294967295, %s1202_s25   ;;  %s790_s10 = sadd.s32 4294967294, %s1202_s25  }
  0x23   : > { %s236_s27 = scalar_lea.hbm %s1642_s2, %s818_s29  ;;  %s35_s29 = sadd.s32 1, %s1194_s23 }
  0x24   : > { %s237_s9 = sshll.u32 %s236_s27, 4  ;;  %p36_p8 = scmp.ge.s32.totalorder %s35_s29, 2  ;;  %s1327_s9 = int_to_ptr.hbm [resolvable:$true] %s237_s9 }
  0x25   : > { %s45_s7 = sadd.s32 1, %s1182_s20  ;;  %p52_p9 = scmp.ne.s32.totalorder %s1182_s20, %s1178_s19 }
  0x26   : > { %p58_p10 = scmp.ne.s32.totalorder %s1178_s19, %s1174_s18  ;;  %s1683_s29 = smov (%p36_p8, %s35_s29), 0 }
  0x27   : > { %1644 = sst [smem:[#allocation22_spill]] %s1683_s29  ;;  %s1685_s6 = smov (!%p36_p8, %s38_s6), %s1198_s24 }
  0x28   : > { %p1352_p11 = por %p53_p0, %p52_p9  ;;  %p59_p12 = scmp.eq.s32.totalorder %s1334_s8, 0 }
  0x29   : > { %p40_p13 = scmp.ge.s32.totalorder %s1685_s6, 2  ;;  %s68_s13 = ssub.s32 %s1194_s23, %s1683_s29 }
  0x2a   : > { %p1362_p1 = por %p59_p12, %p58_p10  ;;  %p69_p3 = scmp.eq.s32.totalorder %s68_s13, 0 }
  0x2b   : > { %s1687_s6 = smov (%p40_p13, %s1685_s6), 0  ;;  %p84_p0 = scmp.ne.s32.totalorder %s1166_s16, %s1162_s15 }
  0x2c   : > { %1647 = sst [smem:[#allocation23_spill]] %s1687_s6  ;;  %s42_s1 = ssub.s32 %s1198_s24, %s1687_s6 }
  0x2d   : > { %s1371_s5 = scalar_select %p69_p3, %s1170_s17, %s71_s26  }
  0x2e   : > { %p43_p5 = scmp.eq.s32.totalorder %s42_s1, 0  ;;  %p160_p6 = scmp.eq.s32.totalorder %s1334_s8, 3 }
  0x2f   : > { %1648 = sst [smem:[#allocation24_spill]] %s1371_s5  ;;  %p1378_p8 = por %p84_p0, %p59_p12 }
  0x30   : > { %p166_p2 = scmp.eq.s32.totalorder %s790_s10, 3  ;;  %p1388_p13 = por %p160_p6, %p52_p9 }
  0x31   : > { %s1383_s29 = scalar_select %p43_p5, %s1182_s20, %s45_s7  }
  0x32   : > { %s1651_s13 = scalar_select %p1388_p13, 1, 0 }
  0x33   : > { %1650 = sst [smem:[#allocation25_spill]] %s1383_s29  ;;  %p1395_p3 = por %p166_p2, %p58_p10 }
  0x34   : > { %1652 = sst [smem:[#allocation26_spill]] %s1651_s13  ;;  %s186_s1 = sand.u32 1, %s1182_s20  }
  0x35   : > { %s1653_s15 = scalar_select %p1395_p3, 1, 0 }
  0x36   : > { %s794_s26 = sshll.u32 %s1198_s24, 3  ;;  %s793_s6 = sshll.u32 %s186_s1, 3 }
  0x37   : > { %1654 = sst [smem:[#allocation27_spill]] %s1653_s15  ;;  %s190_s4 = scalar_lea.vmem [#allocation3], %s793_s6 }
  0x38   : > { %s1655_s0 = sld [smem:[#allocation28_spill]]  ;;  %s198_s13 = sshll.u32 %s190_s4, 4  ;;  %s199_s13 = int_to_ptr.vmem [resolvable:$true] %s198_s13 }
  0x39   : > { %p1656_p2 = scmp.lt.s32.totalorder %s1202_s25, 4  ;;  %s231_s15 = scalar_lea.vmem [#allocation8], %s1302_s30 }
  0x3a   : > { %s239_s20 = sshll.u32 %s231_s15, 4  ;;  %s187_s24 = scalar_lea.sflag [#allocation4], %s186_s1  ;;  %s240_s20 = int_to_ptr.vmem [resolvable:$true] %s239_s20 }
  0x3b   : > { %p832_p9 = pnand %p1656_p2, %p1352_p11  ;;  %s1657_s18 = smov 16  }
  0x3c   : > { %s1658_s10 = smov 256   ;;  %s1659_s7 = smov 512  }
  0x3d   : > { %840 = dma.hbm_to_vmem [thread:$0]  (!%p1310_p4), %s1327_s9, 4096, %s240_s20, %s1314_s12, %s1659_s7, %s1658_s10, %s1657_s18  }
  0x3e   : > { %s194_s29 = scalar_lea.hbm %s1655_s0, %s794_s26  ;;  %s253_s0 = scalar_lea.vmem [#allocation9], %s1302_s30 }
  0x3f   : > { %s196_s5 = sshll.u32 %s194_s29, 4  ;;  %s820_s29 = sshll.u32 %s1194_s23, 8  ;;  %s197_s5 = int_to_ptr.hbm [resolvable:$true] %s196_s5 }
  0x40   : > { %834 = dma.hbm_to_vmem [thread:$0]  (!%p832_p9), %s197_s5, 128, %s199_s13, %s187_s24  }
  0x41   : > { %s258_s26 = scalar_lea.hbm %s1612_s3, %s820_s29  ;;  %s261_s27 = sshll.u32 %s253_s0, 4  ;;  %s262_s27 = int_to_ptr.vmem [resolvable:$true] %s261_s27 }
  0x42   : > { %s259_s25 = sshll.u32 %s258_s26, 4  ;;  %s1660_s22 = sand.u32 1, %s1170_s17   ;;  %s260_s25 = int_to_ptr.hbm [resolvable:$true] %s259_s25 }
  0x43   : > { %s250_s15 = scalar_lea.sflag [#allocation10], %s1660_s22  ;;  %s1207_s21 = smov 128  }
  0x44   : > { %s1208_s1 = smov 8   ;;  %273 = sbr.rel (%p1329_p7) target bundleno = 447 (0x1bf), region = 36 }
  0x45   : > { %843 = dma.hbm_to_vmem [thread:$0]  (!%p1310_p4), %s260_s25, 4096, %s262_s27, %s250_s15, %s1207_s21, %s1207_s21, %s1208_s1  }
  0x46   : > { %s1428_s18 = sand.u32 (!%p1329_p7), 1, %s1178_s19  }
  0x47   : > { %s805_s20 = sshll.u32 (!%p1329_p7), %s1428_s18, 3  ;;  %s276_s0 = scalar_lea.sflag (!%p1329_p7), [#allocation4], %s1428_s18 }
  0x48   : > { %s1432_s24 = scalar_lea.vmem (!%p1329_p7), [#allocation3], %s805_s20 }
  0x49   : > { %1145 = dma.done.wait (%p1362_p1), %s276_s0, 128  }
  0x4a   : > { %1147 = vsyncadd (%p1362_p1), %s276_s0, 4294967168  ;;  %s285_s21 = sand.u32 1, %s1334_s8   ;;  %s287_s22 = sand.u32 1, %s1166_s16  }
  0x4b   : > { %s806_s25 = sshll.u32 %s287_s22, 8  ;;  %s286_s28 = scalar_lea.sflag [#allocation7], %s285_s21 }
  0x4c   : > { %s1440_s30 = scalar_lea.vmem [#allocation6], %s806_s25 }
  0x4d   : > { %1149 = dma.done.wait (%p1378_p8), %s286_s28, 8192  }
  0x4e   : > { %1151 = vsyncadd (%p1378_p8), %s286_s28, 4294959104  ;;  %s1446_s11 = scalar_lea.vmem [#allocation8], %s806_s25  ;;  %s306_s12 = scalar_lea.sflag [#allocation10], %s287_s22 }
  0x4f   : > { %s1448_s14 = scalar_lea.vmem [#allocation9], %s806_s25 }
  0x50   : > { %1153 = dma.done.wait (%p1378_p8), %s306_s12, 4096  }
  0x51   : > { %1155 = vsyncadd (%p1378_p8), %s306_s12, 4294963200  ;;  %s1454_s5 = scalar_lea.vmem [#allocation11], %s805_s20  ;;  %s1661_s9 = sld [smem:[#allocation18_spill]] }
  0x57   : > { %p810_p4 = scmp.ne.s32.totalorder %s1661_s9, 0 }
  0x59   : > { %356 = sbr.rel (%p810_p4) target bundleno = 96 (0x60), region = 56 }
  0x5e   : > { %v1209_v0 = vmov 0.0  }
  0x5f   : > { %357 = vst [vmem:[#allocation2] sm:$0xff] %v1209_v0 }
  0x60 PF: > { %v389_v1 = vld [vmem:[%s1440_s30 + $0xf0] sm:$0xff]  ;;  %v390_v2 = vld [vmem:[%s1440_s30 + $0xf8] sm:$0xff]  ;;  %v387_v3 = vld [vmem:[%s1440_s30 + $0xe0] sm:$0xff]  ;;  %s1662_s2 = sld [smem:[#allocation18_spill]] }
  0x61   : > { %391 = vmatpush.msra.mxu0 %v389_v1  ;;  %411 = vmatpush.msra.mxu1 %v390_v2  ;;  %v388_v4 = vld [vmem:[%s1440_s30 + $0xe8] sm:$0xff]  ;;  %v385_v5 = vld [vmem:[%s1440_s30 + $0xd0] sm:$0xff]  ;;  %v386_v6 = vld [vmem:[%s1440_s30 + $0xd8] sm:$0xff] }
  0x62   : > { %v383_v7 = vld [vmem:[%s1440_s30 + $0xc0] sm:$0xff]  ;;  %v384_v8 = vld [vmem:[%s1440_s30 + $0xc8] sm:$0xff]  ;;  %v381_v9 = vld [vmem:[%s1440_s30 + $0xb0] sm:$0xff] }
  0x63   : > { %392 = vmatpush.msra.mxu0 %v387_v3  ;;  %412 = vmatpush.msra.mxu1 %v388_v4  ;;  %v382_v10 = vld [vmem:[%s1440_s30 + $0xb8] sm:$0xff]  ;;  %v379_v11 = vld [vmem:[%s1440_s30 + $0xa0] sm:$0xff]  ;;  %v380_v12 = vld [vmem:[%s1440_s30 + $0xa8] sm:$0xff] }
  0x64   : > { %v461_v13 = vld [vmem:[%s1446_s11 + $0xf0] sm:$0xff]  ;;  %v462_v15 = vld [vmem:[%s1446_s11 + $0xf8] sm:$0xff]  ;;  %v459_v17 = vld [vmem:[%s1446_s11 + $0xe0] sm:$0xff] }
  0x65   : > { %393 = vmatpush.msra.mxu0 %v385_v5  ;;  %413 = vmatpush.msra.mxu1 %v386_v6  ;;  %v377_v14 = vld [vmem:[%s1440_s30 + $0x90] sm:$0xff]  ;;  %v378_v16 = vld [vmem:[%s1440_s30 + $0x98] sm:$0xff]  ;;  %v460_v18 = vld [vmem:[%s1446_s11 + $0xe8] sm:$0xff] }
  0x66   : > { %463 = vmatpush.msra.mxu2 %v461_v13  ;;  %483 = vmatpush.msra.mxu3 %v462_v15  ;;  %v457_v19 = vld [vmem:[%s1446_s11 + $0xd0] sm:$0xff]  ;;  %v458_v20 = vld [vmem:[%s1446_s11 + $0xd8] sm:$0xff]  ;;  %v375_v21 = vld [vmem:[%s1440_s30 + $0x80] sm:$0xff]  ;;  %p813_p7 = scmp.ne.s32.totalorder %s1662_s2, 1 }
  0x67   : > { %394 = vmatpush.msra.mxu0 %v383_v7  ;;  %414 = vmatpush.msra.mxu1 %v384_v8  ;;  %v376_v22 = vld [vmem:[%s1440_s30 + $0x88] sm:$0xff]  ;;  %v455_v23 = vld [vmem:[%s1446_s11 + $0xc0] sm:$0xff]  ;;  %v373_v25 = vld [vmem:[%s1440_s30 + $0x70] sm:$0xff] }
  0x68   : > { %464 = vmatpush.msra.mxu2 %v459_v17  ;;  %484 = vmatpush.msra.mxu3 %v460_v18  ;;  %v456_v24 = vld [vmem:[%s1446_s11 + $0xc8] sm:$0xff]  ;;  %v374_v26 = vld [vmem:[%s1440_s30 + $0x78] sm:$0xff]  ;;  %v453_v27 = vld [vmem:[%s1446_s11 + $0xb0] sm:$0xff] }
  0x69   : > { %395 = vmatpush.msra.mxu0 %v381_v9  ;;  %415 = vmatpush.msra.mxu1 %v382_v10  ;;  %v454_v28 = vld [vmem:[%s1446_s11 + $0xb8] sm:$0xff]  ;;  %v371_v29 = vld [vmem:[%s1440_s30 + $0x60] sm:$0xff]  ;;  %v372_v30 = vld [vmem:[%s1440_s30 + $0x68] sm:$0xff] }
  0x6a   : > { %465 = vmatpush.msra.mxu2 %v457_v19  ;;  %485 = vmatpush.msra.mxu3 %v458_v20  ;;  %v451_v31 = vld [vmem:[%s1446_s11 + $0xa0] sm:$0xff]  ;;  %v452_v32 = vld [vmem:[%s1446_s11 + $0xa8] sm:$0xff]  ;;  %v369_v33 = vld [vmem:[%s1440_s30 + $0x50] sm:$0xff] }
  0x6b   : > { %396 = vmatpush.msra.mxu0 %v379_v11  ;;  %416 = vmatpush.msra.mxu1 %v380_v12  ;;  %v370_v34 = vld [vmem:[%s1440_s30 + $0x58] sm:$0xff]  ;;  %v449_v35 = vld [vmem:[%s1446_s11 + $0x90] sm:$0xff]  ;;  %v367_v37 = vld [vmem:[%s1440_s30 + $0x40] sm:$0xff] }
  0x6c   : > { %466 = vmatpush.msra.mxu2 %v455_v23  ;;  %486 = vmatpush.msra.mxu3 %v456_v24  ;;  %v450_v36 = vld [vmem:[%s1446_s11 + $0x98] sm:$0xff]  ;;  %v368_v38 = vld [vmem:[%s1440_s30 + $0x48] sm:$0xff]  ;;  %v447_v39 = vld [vmem:[%s1446_s11 + $0x80] sm:$0xff] }
  0x6d   : > { %397 = vmatpush.msra.mxu0 %v377_v14  ;;  %417 = vmatpush.msra.mxu1 %v378_v16  ;;  %v448_v40 = vld [vmem:[%s1446_s11 + $0x88] sm:$0xff]  ;;  %v365_v41 = vld [vmem:[%s1440_s30 + $0x30] sm:$0xff]  ;;  %v366_v42 = vld [vmem:[%s1440_s30 + $0x38] sm:$0xff] }
  0x6e   : > { %467 = vmatpush.msra.mxu2 %v453_v27  ;;  %487 = vmatpush.msra.mxu3 %v454_v28  ;;  %v445_v43 = vld [vmem:[%s1446_s11 + $0x70] sm:$0xff]  ;;  %v446_v44 = vld [vmem:[%s1446_s11 + $0x78] sm:$0xff]  ;;  %v363_v45 = vld [vmem:[%s1440_s30 + $0x20] sm:$0xff] }
  0x6f   : > { %398 = vmatpush.msra.mxu0 %v375_v21  ;;  %418 = vmatpush.msra.mxu1 %v376_v22  ;;  %v364_v46 = vld [vmem:[%s1440_s30 + $0x28] sm:$0xff]  ;;  %v443_v47 = vld [vmem:[%s1446_s11 + $0x60] sm:$0xff]  ;;  %v361_v49 = vld [vmem:[%s1440_s30 + $0x10] sm:$0xff] }
  0x70   : > { %468 = vmatpush.msra.mxu2 %v451_v31  ;;  %488 = vmatpush.msra.mxu3 %v452_v32  ;;  %v444_v48 = vld [vmem:[%s1446_s11 + $0x68] sm:$0xff]  ;;  %v362_v50 = vld [vmem:[%s1440_s30 + $0x18] sm:$0xff]  ;;  %v441_v51 = vld [vmem:[%s1446_s11 + $0x50] sm:$0xff] }
  0x71   : > { %399 = vmatpush.msra.mxu0 %v373_v25  ;;  %419 = vmatpush.msra.mxu1 %v374_v26  ;;  %v442_v52 = vld [vmem:[%s1446_s11 + $0x58] sm:$0xff]  ;;  %v359_v53 = vld [vmem:[%s1440_s30] sm:$0xff]  ;;  %v360_v54 = vld [vmem:[%s1440_s30 + $0x8] sm:$0xff] }
  0x72   : > { %469 = vmatpush.msra.mxu2 %v449_v35  ;;  %489 = vmatpush.msra.mxu3 %v450_v36  ;;  %v358_v55 = vld [vmem:[%s1432_s24] sm:$0xff]  ;;  %v439_v56 = vld [vmem:[%s1446_s11 + $0x40] sm:$0xff]  ;;  %v440_v57 = vld [vmem:[%s1446_s11 + $0x48] sm:$0xff] }
  0x73   : > { %400 = vmatpush.msra.mxu0 %v371_v29  ;;  %420 = vmatpush.msra.mxu1 %v372_v30  ;;  %v437_v58 = vld [vmem:[%s1446_s11 + $0x30] sm:$0xff]  ;;  %v438_v59 = vld [vmem:[%s1446_s11 + $0x38] sm:$0xff]  ;;  %v435_v60 = vld [vmem:[%s1446_s11 + $0x20] sm:$0xff] }
  0x74   : > { %470 = vmatpush.msra.mxu2 %v447_v39  ;;  %490 = vmatpush.msra.mxu3 %v448_v40  ;;  %v436_v61 = vld [vmem:[%s1446_s11 + $0x28] sm:$0xff]  ;;  %v433_v62 = vld [vmem:[%s1446_s11 + $0x10] sm:$0xff]  ;;  %v434_v63 = vld [vmem:[%s1446_s11 + $0x18] sm:$0xff] }
  0x75   : > { %401 = vmatpush.msra.mxu0 %v369_v33  ;;  %421 = vmatpush.msra.mxu1 %v370_v34  ;;  %v431_v0 = vld [vmem:[%s1446_s11] sm:$0xff]  ;;  %v432_v1 = vld [vmem:[%s1446_s11 + $0x8] sm:$0xff]  ;;  %v561_v2 = vld [vmem:[%s1448_s14 + $0x78] sm:$0xff] }
  0x76   : > { %471 = vmatpush.msra.mxu2 %v445_v43  ;;  %491 = vmatpush.msra.mxu3 %v446_v44  ;;  %v577_v3 = vld [vmem:[%s1448_s14 + $0xf8] sm:$0xff]  ;;  %v560_v4 = vld [vmem:[%s1448_s14 + $0x70] sm:$0xff]  ;;  %v559_v6 = vld [vmem:[%s1448_s14 + $0x68] sm:$0xff] }
  0x77   : > { %402 = vmatpush.msra.mxu0 %v367_v37  ;;  %422 = vmatpush.msra.mxu1 %v368_v38  ;;  %v576_v5 = vld [vmem:[%s1448_s14 + $0xf0] sm:$0xff]  ;;  %v575_v7 = vld [vmem:[%s1448_s14 + $0xe8] sm:$0xff]  ;;  %v558_v8 = vld [vmem:[%s1448_s14 + $0x60] sm:$0xff] }
  0x78   : > { %472 = vmatpush.msra.mxu2 %v443_v47  ;;  %492 = vmatpush.msra.mxu3 %v444_v48  ;;  %v574_v9 = vld [vmem:[%s1448_s14 + $0xe0] sm:$0xff]  ;;  %v557_v10 = vld [vmem:[%s1448_s14 + $0x58] sm:$0xff]  ;;  %v556_v12 = vld [vmem:[%s1448_s14 + $0x50] sm:$0xff] }
  0x79   : > { %403 = vmatpush.msra.mxu0 %v365_v41  ;;  %423 = vmatpush.msra.mxu1 %v366_v42  ;;  %v573_v11 = vld [vmem:[%s1448_s14 + $0xd8] sm:$0xff]  ;;  %v572_v13 = vld [vmem:[%s1448_s14 + $0xd0] sm:$0xff]  ;;  %v555_v14 = vld [vmem:[%s1448_s14 + $0x48] sm:$0xff] }
  0x7a   : > { %473 = vmatpush.msra.mxu2 %v441_v51  ;;  %493 = vmatpush.msra.mxu3 %v442_v52  ;;  %v571_v15 = vld [vmem:[%s1448_s14 + $0xc8] sm:$0xff]  ;;  %v554_v16 = vld [vmem:[%s1448_s14 + $0x40] sm:$0xff]  ;;  %v553_v18 = vld [vmem:[%s1448_s14 + $0x38] sm:$0xff] }
  0x7b   : > { %404 = vmatpush.msra.mxu0 %v363_v45  ;;  %424 = vmatpush.msra.mxu1 %v364_v46  ;;  %v570_v17 = vld [vmem:[%s1448_s14 + $0xc0] sm:$0xff]  ;;  %v569_v19 = vld [vmem:[%s1448_s14 + $0xb8] sm:$0xff]  ;;  %v552_v20 = vld [vmem:[%s1448_s14 + $0x30] sm:$0xff] }
  0x7c   : > { %474 = vmatpush.msra.mxu2 %v439_v56  ;;  %494 = vmatpush.msra.mxu3 %v440_v57  ;;  %v568_v21 = vld [vmem:[%s1448_s14 + $0xb0] sm:$0xff]  ;;  %v551_v22 = vld [vmem:[%s1448_s14 + $0x28] sm:$0xff]  ;;  %v550_v24 = vld [vmem:[%s1448_s14 + $0x20] sm:$0xff] }
  0x7d   : > { %405 = vmatpush.msra.mxu0 %v361_v49  ;;  %425 = vmatpush.msra.mxu1 %v362_v50  ;;  %v567_v23 = vld [vmem:[%s1448_s14 + $0xa8] sm:$0xff]  ;;  %v566_v25 = vld [vmem:[%s1448_s14 + $0xa0] sm:$0xff]  ;;  %v549_v26 = vld [vmem:[%s1448_s14 + $0x18] sm:$0xff] }
  0x7e   : > { %475 = vmatpush.msra.mxu2 %v437_v58  ;;  %495 = vmatpush.msra.mxu3 %v438_v59  ;;  %v565_v27 = vld [vmem:[%s1448_s14 + $0x98] sm:$0xff]  ;;  %v548_v28 = vld [vmem:[%s1448_s14 + $0x10] sm:$0xff]  ;;  %v547_v30 = vld [vmem:[%s1448_s14 + $0x8] sm:$0xff] }
  0x7f   : > { %406 = vmatpush.msra.mxu0 %v359_v53  ;;  %426 = vmatpush.msra.mxu1 %v360_v54  ;;  %v564_v29 = vld [vmem:[%s1448_s14 + $0x90] sm:$0xff]  ;;  %v563_v31 = vld [vmem:[%s1448_s14 + $0x88] sm:$0xff]  ;;  %v546_v34 = vld [vmem:[%s1448_s14] sm:$0xff] }
  0x80   : > { %407 = vmatmul.f32.vlgmr.msra.gmra.mxu0 %v358_v55  ;;  %427 = vmatmul.f32.vlgmr.msra.gmra.mxu1 %v358_v55  ;;  %v562_v35 = vld [vmem:[%s1448_s14 + $0x80] sm:$0xff] }
  0x81   : > { %476 = vmatpush.msra.mxu2 %v435_v60  ;;  %496 = vmatpush.msra.mxu3 %v436_v61 }
  0x82   : > { %578 = vmatpush.msrb.mxu0 %v561_v2  ;;  %598 = vmatpush.msrb.mxu1 %v577_v3 }
  0x83   : > { %477 = vmatpush.msra.mxu2 %v433_v62  ;;  %497 = vmatpush.msra.mxu3 %v434_v63 }
  0x84   : > { %579 = vmatpush.msrb.mxu0 %v560_v4  ;;  %599 = vmatpush.msrb.mxu1 %v576_v5  ;;  %v545_v5 = vld [vmem:[#allocation2] sm:$0xff] }
  0x85   : > { %478 = vmatpush.msra.mxu2 %v431_v0  ;;  %498 = vmatpush.msra.mxu3 %v432_v1 }
  0x86   : > { %479 = vmatmul.f32.vlgmr.msra.gmra.mxu2 %v358_v55  ;;  %499 = vmatmul.f32.vlgmr.msra.gmra.mxu3 %v358_v55 }
  0x87   : > { %580 = vmatpush.msrb.mxu0 %v559_v6  ;;  %600 = vmatpush.msrb.mxu1 %v575_v7 }
  0x89   : > { %581 = vmatpush.msrb.mxu0 %v558_v8  ;;  %601 = vmatpush.msrb.mxu1 %v574_v9 }
  0x8b   : > { %582 = vmatpush.msrb.mxu0 %v557_v10  ;;  %602 = vmatpush.msrb.mxu1 %v573_v11 }
  0x8d   : > { %583 = vmatpush.msrb.mxu0 %v556_v12  ;;  %603 = vmatpush.msrb.mxu1 %v572_v13 }
  0x8f   : > { %584 = vmatpush.msrb.mxu0 %v555_v14  ;;  %604 = vmatpush.msrb.mxu1 %v571_v15 }
  0x91   : > { %585 = vmatpush.msrb.mxu0 %v554_v16  ;;  %605 = vmatpush.msrb.mxu1 %v570_v17 }
  0x93   : > { %586 = vmatpush.msrb.mxu0 %v553_v18  ;;  %606 = vmatpush.msrb.mxu1 %v569_v19 }
  0x95   : > { %587 = vmatpush.msrb.mxu0 %v552_v20  ;;  %607 = vmatpush.msrb.mxu1 %v568_v21 }
  0x97   : > { %588 = vmatpush.msrb.mxu0 %v551_v22  ;;  %608 = vmatpush.msrb.mxu1 %v567_v23 }
  0x99   : > { %589 = vmatpush.msrb.mxu0 %v550_v24  ;;  %609 = vmatpush.msrb.mxu1 %v566_v25 }
  0x9b   : > { %590 = vmatpush.msrb.mxu0 %v549_v26  ;;  %610 = vmatpush.msrb.mxu1 %v565_v27 }
  0x9d   : > { %591 = vmatpush.msrb.mxu0 %v548_v28  ;;  %611 = vmatpush.msrb.mxu1 %v564_v29 }
  0x9f   : > { %592 = vmatpush.msrb.mxu0 %v547_v30  ;;  %612 = vmatpush.msrb.mxu1 %v563_v31 }
  0xa1   : > { %593 = vmatpush.msrb.mxu0 %v546_v34  ;;  %613 = vmatpush.msrb.mxu1 %v562_v35 }
  0xfd   : > { %v408_v32 = vpop.f32.mrf.mxu0  ;;  %v428_v33 = vpop.f32.mrf.mxu1 }
  0xfe   : > { %v811_v36 = vmul.f32 -1.442695, %v408_v32  ;;  %v812_v37 = vmul.f32 -1.442695, %v428_v33 }
 0x100   : > { %944 = vpow2.f32 %v811_v36 }
 0x101   : > { %946 = vpow2.f32 %v812_v37 }
 0x106   : > { %v945_v38 = vpop.eup %944 }
 0x107   : > { %v947_v39 = vpop.eup %946  ;;  %v509_v40 = vadd.f32 1.0, %v945_v38 }
 0x108   : > { %v510_v41 = vadd.f32 1.0, %v947_v39 }
 0x109   : > { %948 = vrcp.f32 %v509_v40  ;;  %v522_v47 = vand.u32 2147483648, %v509_v40  ;;  %v520_v50 = vand.u32 2147483647, %v509_v40  ;;  %vm516_vm2 = vweird.f32 %v509_v40  ;;  %v480_v61 = vpop.f32.mrf.mxu2  ;;  %v500_v0 = vpop.f32.mrf.mxu3 }
 0x10a   : > { %950 = vrcp.f32 %v510_v41  ;;  %v537_v51 = vand.u32 2147483648, %v510_v41  ;;  %v535_v53 = vand.u32 2147483647, %v510_v41  ;;  %vm531_vm4 = vweird.f32 %v510_v41 }
 0x10b   : > { %v523_v55 = vor.u32 1.1754944e-38, %v522_v47  ;;  %vm521_vm5 = vcmp.eq.f32.partialorder %v520_v50, 8.507059e+37 }
 0x10c   : > { %v538_v58 = vor.u32 1.1754944e-38, %v537_v51  ;;  %vm536_vm7 = vcmp.eq.f32.partialorder %v535_v53, 8.507059e+37 }
 0x10f   : > { %v949_v42 = vpop.eup %948 }
 0x110   : > { %v951_v43 = vpop.eup %950  ;;  %v512_v44 = vmul.f32 %v949_v42, %v509_v40  ;;  %vm517_vm0 = vweird.f32 %v949_v42 }
 0x111   : > { %v527_v45 = vmul.f32 %v951_v43, %v510_v41  ;;  %vm532_vm1 = vweird.f32 %v951_v43  ;;  %vm518_vm3 = vmor %vm516_vm2, %vm517_vm0 }
 0x112   : > { %v513_v46 = vsub.f32 1.0, %v512_v44  ;;  %vm533_vm6 = vmor %vm531_vm4, %vm532_vm1 }
 0x113   : > { %v528_v48 = vsub.f32 1.0, %v527_v45 }
 0x114   : > { %v514_v49 = vmul.f32 %v949_v42, %v513_v46 }
 0x115   : > { %v529_v52 = vmul.f32 %v951_v43, %v528_v48 }
 0x116   : > { %v515_v54 = vadd.f32 %v949_v42, %v514_v49 }
 0x117   : > { %v530_v56 = vadd.f32 %v951_v43, %v529_v52 }
 0x118   : > { %v519_v57 = vsel %vm518_vm3, %v949_v42, %v515_v54 }
 0x119   : > { %v524_v59 = vsel %vm521_vm5, %v523_v55, %v519_v57  ;;  %v534_v60 = vsel %vm533_vm6, %v951_v43, %v530_v56 }
 0x11a   : > { %v541_v62 = vmul.f32 %v524_v59, %v408_v32  ;;  %v539_v63 = vsel %vm536_vm7, %v538_v58, %v534_v60 }
 0x11b   : > { %v542_v1 = vmul.f32 %v539_v63, %v428_v33 }
 0x11c   : > { %v543_v2 = vmul.f32 %v541_v62, %v480_v61 }
 0x11d   : > { %v544_v3 = vmul.f32 %v542_v1, %v500_v0 }
 0x11e   : > { %594 = vmatmul.f32.vlgmr.msrb.gmra.mxu0 %v543_v2 }
 0x11f   : > { %614 = vmatmul.f32.vlgmr.msrb.gmra.mxu1 %v544_v3 }
 0x19b   : > { %v595_v4 = vpop.f32.mrf.mxu0 }
 0x19c   : > { %v615_v6 = vpop.f32.mrf.mxu1 }
 0x19d   : > { %v616_v7 = vadd.f32 %v615_v6, %v595_v4  ;;  %623 = sbr.rel (%p813_p7) target bundleno = 426 (0x1aa), region = 60 }
 0x19f   : > { %v618_v8 = vadd.f32 %v616_v7, %v545_v5 }
 0x1a1   : > { %619 = vst [vmem:[#allocation2] sm:$0xff] %v618_v8 }
 0x1a8   : > { %v624_v9 = vld [vmem:[#allocation2] sm:$0xff] }
 0x1a9   : > { %625 = vst [vmem:[%s1454_s5] sm:$0xff] %v624_v9 }
 0x1aa PF: > { %s1663_s8 = sld [smem:[#allocation19_spill]]  ;;  %s639_s26 = sshll.u32 %s1454_s5, 4  ;;  %s640_s26 = int_to_ptr.vmem [resolvable:$true] %s639_s26 }
 0x1ab   : > { %s1665_s6 = sld [smem:[#allocation31_spill]]  ;;  %s627_s15 = scalar_lea.sflag [#allocation5], %s1428_s18 }
 0x1b0   : > { %s815_s10 = sshll.u32 %s1663_s8, 3 }
 0x1b1   : > { %s637_s4 = scalar_lea.hbm %s1665_s6, %s815_s10  ;;  %s1092_s21 = scalar_lea.hbm %s1665_s6, 16 }
 0x1b2   : > { %s641_s27 = sshll.u32 %s637_s4, 4  ;;  %s642_s27 = int_to_ptr.hbm [resolvable:$true] %s641_s27 }
 0x1b3   : > { %s1086_s1 = sshra.s32 %s642_s27, 4  ;;  %s1087_s1 = int_to_ptr.hbm [resolvable:$true] %s1086_s1 }
 0x1b4   : > { %s1088_s20 = scalar_lea.hbm %s1087_s1, 8  ;;  %p1093_p1 = scmp.lt.s32.totalorder %s1087_s1, %s1665_s6 }
 0x1b5   : > { %p1089_p10 = scmp.ne.s32.totalorder %s1087_s1, %s1088_s20  ;;  %p1094_p0 = scmp.lt.s32.totalorder %s1092_s21, %s1088_s20 }
 0x1b7   : > { %p1090_p11 = pnand %p1089_p10, %p1388_p13  ;;  %p1095_p5 = por %p1094_p0, %p1093_p1 }
 0x1b9   : > { %p1091_p12 = pneg %p1090_p11 }
 0x1bb   : > { %p1096_p6 = pnand %p1095_p5, %p1091_p12 }
 0x1bd   : > { %1099 = shalt.err (!%p1096_p6)
}
 0x1be   : > { %829 = dma.vmem_to_hbm [thread:$0]  (%p1388_p13), %s640_s26, 128, %s642_s27, %s627_s15  }
 0x1bf PF: > { %s1666_s18 = sld [smem:[#allocation21_spill]] }
 0x1c0   : > { %s1667_s28 = sld [smem:[#allocation16_spill]] }
 0x1c5   : > { %p849_p8 = scmp.ge.s32.totalorder %s1666_s18, 2 }
 0x1c6   : > { %s653_s11 = sand.u32 1, %s1667_s28  }
 0x1c7   : > { %p845_p2 = pnand %p849_p8, %p1395_p3  ;;  %s654_s12 = scalar_lea.sflag [#allocation5], %s653_s11 }
 0x1c9   : > { %p846_p9 = pneg %p845_p2 }
 0x1cb   : > { %1157 = dma.done.wait (%p846_p9), %s654_s12, 128  }
 0x1cc   : > { %1159 = vsyncadd (%p846_p9), %s654_s12, 4294967168  ;;  %s26_s25 = sadd.s32 1, %s1666_s18   ;;  %s1669_s14 = sld [smem:[#allocation24_spill]] }
 0x1cd   : > { %p23_p4 = scmp.ge.s32.totalorder %s26_s25, 6   ;;  %s1670_s5 = sld [smem:[#allocation17_spill]] }
 0x1ce   : > { %s1671_s20 = sld [smem:[#allocation25_spill]]  ;;  %s1675_s15 = smov %s1166_s16 }
 0x1cf   : > { %s1672_s22 = sld [smem:[#allocation20_spill]]  ;;  %s1676_s16 = smov %s1170_s17 }
 0x1d0   : > { %s1673_s9 = sld [smem:[#allocation22_spill]]  ;;  %s1678_s18 = smov %s1178_s19 }
 0x1d1   : > { %s1674_s24 = sld [smem:[#allocation23_spill]]  ;;  %s1680_s21 = smov %s1194_s23 }
 0x1d2   : > { %s1677_s17 = smov %s1669_s14  ;;  %25 = sbr.rel (!%p23_p4) target bundleno = 18 (0x12), region = 126 }
 0x1d3   : > { %s1679_s19 = smov %s1670_s5 }
 0x1d6   : > { %s1681_s23 = smov %s1673_s9 }
 0x1d7   :  { %660 = vsyncpa [#allocation4], 1 }
 0x1d8   :  { %662 = vsyncpa [#allocation4 + $0x1], 1 }
 0x1d9   :  { %663 = vsyncpa [#allocation7], 1 }
 0x1da   :  { %665 = vsyncpa [#allocation7 + $0x1], 1 }
 0x1db   :  { %666 = vsyncpa [#allocation10], 1 }
 0x1dc   :  { %668 = vsyncpa [#allocation10 + $0x1], 1 }
 0x1dd   :  { %669 = vsyncpa [#allocation5], 1 }
 0x1de   :  { %671 = vsyncpa [#allocation5 + $0x1], 1 }

</bundles_post_ra>
